<compile_context>
chip_gen: v5e
topology: v5e:2x2
jax: 0.10.0
libtpu: 0.0.40
codegen_flags: <defaults>
</compile_context>

<pallas_src>
import jax
import jax.numpy as jnp
from jax.experimental import pallas as pl
from jax.experimental.pallas import tpu as pltpu

N_CLASS = 4
EPS = 1e-07
REG_COEFF = 0.0001
MAX_TILE = 8192   # max lanes per block; (4, 8192) f32 block = 128 KiB / input


# ----------------------------------------------------------------------------
# Pallas kernel: for one batch element, accumulate over HW tiles the two
# per-class sums dice needs (p = softmax(logits) over the class axis):
#   num[c] = sum p[c] * y[c]
#   den[c] = sum (p[c]^2 + y[c]^2)
# Lane-wise accumulation lives in VMEM scratch; cross-lane reductions and the
# (C, 2) store run only on the last HW tile of each batch element.
# ----------------------------------------------------------------------------
def _dice_sums_kernel(x_ref, y_ref, out_ref, num_acc, den_acc):
    i = pl.program_id(1)

    @pl.when(i == 0)
    def _():
        num_acc[...] = jnp.zeros_like(num_acc)
        den_acc[...] = jnp.zeros_like(den_acc)

    x = x_ref[...].astype(jnp.float32)   # (C, TILE)
    y = y_ref[...].astype(jnp.float32)   # (C, TILE)

    # numerically stable softmax over the class (sublane) axis
    m = jnp.max(x, axis=0, keepdims=True)
    e = jnp.exp(x - m)
    p = e * pl.reciprocal(jnp.sum(e, axis=0, keepdims=True), approx=True)

    # pure lane-wise FMAs every step; no XLU, no narrow masked stores
    num_acc[...] += p * y
    den_acc[...] += p * p + y * y

    @pl.when(i == pl.num_programs(1) - 1)
    def _():
        out_ref[...] = jnp.concatenate(
            [jnp.sum(num_acc[...], axis=1, keepdims=True),
             jnp.sum(den_acc[...], axis=1, keepdims=True)],
            axis=1)                                         # (C, 2)


def _pick_tile(hw):
    """Choose a lane tile: full H*W if it fits, otherwise the largest
    multiple-of-128 divisor of hw (no padding copy), else MAX_TILE + pad."""
    if hw <= MAX_TILE:
        return hw, 0
    for k in range(MAX_TILE // 128, 7, -1):   # tiles >= 1024 lanes
        tile = k * 128
        if hw % tile == 0:
            return tile, 0
    return MAX_TILE, (-hw) % MAX_TILE


def dice_loss_pallas(logits_nchw, label_nchw):
    n, c, h, w = logits_nchw.shape
    hw = h * w

    # NCHW -> (N, C, H*W) is a free view: no HBM transpose/materialization.
    x = logits_nchw.reshape(n, c, hw)
    y = label_nchw.reshape(n, c, hw)

    tile, pad = _pick_tile(hw)
    if pad:
        x = jnp.pad(x, ((0, 0), (0, 0), (0, pad)))
        y = jnp.pad(y, ((0, 0), (0, 0), (0, pad)))
    n_tiles = (hw + pad) // tile

    sums = pl.pallas_call(
        _dice_sums_kernel,
        out_shape=jax.ShapeDtypeStruct((n, c, 2), jnp.float32),
        grid_spec=pltpu.PrefetchScalarGridSpec(
            num_scalar_prefetch=0,
            grid=(n, n_tiles),
            in_specs=[
                pl.BlockSpec((None, c, tile), lambda b, i: (b, 0, i)),
                pl.BlockSpec((None, c, tile), lambda b, i: (b, 0, i)),
            ],
            out_specs=pl.BlockSpec((None, c, 2), lambda b, i: (b, 0, 0)),
            scratch_shapes=[
                pltpu.VMEM((c, tile), jnp.float32),   # num_acc
                pltpu.VMEM((c, tile), jnp.float32),   # den_acc
            ],
        ),
        compiler_params=pltpu.CompilerParams(
            # batch axis can be sharded across TensorCores (v7x megacore);
            # the HW axis carries the scratch accumulators -> arbitrary.
            dimension_semantics=("parallel", "arbitrary")),
    )(x, y)

    inse = jnp.sum(sums[:, :, 0], axis=0)    # (C,)
    denom = jnp.sum(sums[:, :, 1], axis=0)   # (C,)  = l + r per class

    if pad:
        # Zero-padded logits columns softmax to exactly 1/C per class and the
        # padded labels are zero, so the only spurious contribution is
        # n * pad * (1/C)^2 added to every class of the denominator.
        denom = denom - (n * pad) / (c * c)

    dice = jnp.sum(2.0 * inse / (denom + EPS))
    return 1.0 - dice / c


# ----------------------------------------------------------------------------
# MyLoss.forward equivalent:
#   cross_flag=False, dice_flag=True, miu_dice=1.0  -> loss = dice loss
#   regularizer = REG_COEFF * sum(||w||_F) over net weights whose name contains
#   'weight' but not '.2.' and not 'extra.1'
# ----------------------------------------------------------------------------
def my_loss_forward(logits, label, net_state_dict):
    loss = 1.0 * dice_loss_pallas(logits, label)

    # parameter-norm regularizer (glue: tiny tensors, plain JAX)
    # TODO(synk): the cross-entropy branch is statically disabled
    # (cross_flag=False in the reference) and therefore not implemented.
    regularizers = 0.0
    for name, wgt in net_state_dict.items():
        if ("weight" in name) and (".2." not in name) and ("extra.1" not in name):
            regularizers = regularizers + jnp.sqrt(
                jnp.sum(wgt.astype(jnp.float32) ** 2))
    return loss, REG_COEFF * regularizers


# pure-JAX reference for the dice loss (sanity check)
def _dice_loss_ref(logits, label):
    p = jax.nn.softmax(logits.astype(jnp.float32), axis=1)
    label = label.astype(jnp.float32)
    dice = 0.0
    for i in range(N_CLASS):
        inse = jnp.sum(p[:, i] * label[:, i])
        l = jnp.sum(p[:, i] * p[:, i])
        r = jnp.sum(label[:, i] * label[:, i])
        dice = dice + 2.0 * inse / (l + r + EPS)
    return 1.0 - dice / N_CLASS


if __name__ == "__main__":
    key = jax.random.PRNGKey(0)
    k_logits, k_label, k_net = jax.random.split(key, 3)

    N, C, H, W = 2, 4, 16, 16
    logits = jax.random.normal(k_logits, (N, C, H, W), jnp.float32)
    classes = jax.random.randint(k_label, (N, H, W), 0, C)
    label = jnp.transpose(jax.nn.one_hot(classes, C, dtype=jnp.float32),
                          (0, 3, 1, 2))

    # deterministic synthetic "net" state_dict (shapes of a tiny seg net);
    # entries with '.2.' or 'extra.1' in the name are intentionally excluded
    # by the filter, and bias entries lack 'weight'.
    net_shapes = {
        "down.0.weight": (8, 4, 3, 3),
        "down.0.bias": (8,),
        "down.1.weight": (8,),          # e.g. a BatchNorm weight
        "down.2.weight": (8, 8, 3, 3),  # excluded ('.2.')
        "up.0.weight": (4, 8, 3, 3),
        "extra.1.weight": (4, 4, 1, 1),  # excluded ('extra.1')
    }
    net_state = {}
    kk = k_net
    for name, shape in net_shapes.items():
        kk, sub = jax.random.split(kk)
        net_state[name] = jax.random.normal(sub, shape, jnp.float32) * 0.1

    loss, reg = my_loss_forward(logits, label, net_state)
    loss = jax.block_until_ready(loss)
    reg = jax.block_until_ready(reg)

    # correctness check against a pure-JAX reference of the dice loss
    # (tolerance 1e-4: approx reciprocal in the softmax denominator perturbs
    # the result slightly below the 1e-5 level; keep margin against flake)
    ref_loss = _dice_loss_ref(logits, label)
    assert jnp.allclose(loss, ref_loss, atol=1e-4, rtol=1e-4), (loss, ref_loss)

    print("KERNEL_OK")
</pallas_src>

<mosaic_0001>
module attributes {stable_mosaic.version = 11 : i64} {
  func.func @_dice_sums_kernel(%arg0: i32, %arg1: i32, %arg2: memref<1x4x256xf32, #tpu.memory_space<vmem>>, %arg3: memref<1x4x256xf32, #tpu.memory_space<vmem>>, %arg4: memref<1x4x2xf32, #tpu.memory_space<vmem>>, %arg5: memref<4x256xf32, #tpu.memory_space<vmem>>, %arg6: memref<4x256xf32, #tpu.memory_space<vmem>>) attributes {dimension_semantics = [#tpu.dimension_semantics<parallel>, #tpu.dimension_semantics<arbitrary>], iteration_bounds = array<i64: 2, 1>, scalar_prefetch = 0 : i64, scratch_operands = 2 : i64, tpu.core_type = #tpu.core_type<tc>, window_params = [{transform_indices = @transform_0, window_bounds = array<i64: 1, 4, 256>}, {transform_indices = @transform_1, window_bounds = array<i64: 1, 4, 256>}, {transform_indices = @transform_2, window_bounds = array<i64: 1, 4, 2>}]} {
    %c0_i32 = arith.constant 0 : i32
    %0 = arith.cmpi eq, %arg1, %c0_i32 : i32
    %1 = arith.extui %0 : i1 to i32
    %c0_i32_0 = arith.constant 0 : i32
    %2 = arith.cmpi ne, %1, %c0_i32_0 : i32
    scf.if %2 {
      %cst_17 = arith.constant 0.000000e+00 : f32
      %30 = vector.broadcast %cst_17 : f32 to vector<4x256xf32>
      %c0_18 = arith.constant 0 : index
      %c0_19 = arith.constant 0 : index
      %31 = vector.load %arg5[%c0_18, %c0_19] : memref<4x256xf32, #tpu.memory_space<vmem>>, vector<4x256xf32>
      tpu.vector_store %arg5[%c0_18, %c0_19], %30 {strides = array<i32>} : memref<4x256xf32, #tpu.memory_space<vmem>>, vector<4x256xf32>,
      %cst_20 = arith.constant 0.000000e+00 : f32
      %32 = vector.broadcast %cst_20 : f32 to vector<4x256xf32>
      %c0_21 = arith.constant 0 : index
      %c0_22 = arith.constant 0 : index
      %33 = vector.load %arg6[%c0_21, %c0_22] : memref<4x256xf32, #tpu.memory_space<vmem>>, vector<4x256xf32>
      tpu.vector_store %arg6[%c0_21, %c0_22], %32 {strides = array<i32>} : memref<4x256xf32, #tpu.memory_space<vmem>>, vector<4x256xf32>,
    } else {
    }
    %c0 = arith.constant 0 : index
    %c0_1 = arith.constant 0 : index
    %c0_2 = arith.constant 0 : index
    %3 = vector.load %arg2[%c0, %c0_1, %c0_2] : memref<1x4x256xf32, #tpu.memory_space<vmem>>, vector<1x4x256xf32>
    %4 = vector.shape_cast %3 : vector<1x4x256xf32> to vector<4x256xf32>
    %c0_3 = arith.constant 0 : index
    %c0_4 = arith.constant 0 : index
    %c0_5 = arith.constant 0 : index
    %5 = vector.load %arg3[%c0_3, %c0_4, %c0_5] : memref<1x4x256xf32, #tpu.memory_space<vmem>>, vector<1x4x256xf32>
    %6 = vector.shape_cast %5 : vector<1x4x256xf32> to vector<4x256xf32>
    %cst = arith.constant dense<0xFF800000> : vector<256xf32>
    %7 = vector.multi_reduction <maximumf>, %4, %cst [0] : vector<4x256xf32> to vector<256xf32>
    %8 = vector.shape_cast %7 : vector<256xf32> to vector<1x256xf32>
    %9 = vector.broadcast %8 : vector<1x256xf32> to vector<4x256xf32>
    %10 = arith.subf %4, %9 : vector<4x256xf32>
    %11 = math.exp %10 : vector<4x256xf32>
    %cst_6 = arith.constant dense<0.000000e+00> : vector<256xf32>
    %12 = vector.multi_reduction <add>, %11, %cst_6 [0] : vector<4x256xf32> to vector<256xf32>
    %13 = vector.shape_cast %12 : vector<256xf32> to vector<1x256xf32>
    %14 = tpu.reciprocal %13 {approx = true} : vector<1x256xf32> -> vector<1x256xf32>
    %15 = vector.broadcast %14 : vector<1x256xf32> to vector<4x256xf32>
    %16 = arith.mulf %11, %15 : vector<4x256xf32>
    %c0_7 = arith.constant 0 : index
    %c0_8 = arith.constant 0 : index
    %17 = vector.load %arg5[%c0_7, %c0_8] : memref<4x256xf32, #tpu.memory_space<vmem>>, vector<4x256xf32>
    %18 = arith.mulf %16, %6 : vector<4x256xf32>
    %19 = arith.addf %17, %18 : vector<4x256xf32>
    %c0_9 = arith.constant 0 : index
    %c0_10 = arith.constant 0 : index
    %20 = vector.load %arg5[%c0_9, %c0_10] : memref<4x256xf32, #tpu.memory_space<vmem>>, vector<4x256xf32>
    tpu.vector_store %arg5[%c0_9, %c0_10], %19 {strides = array<i32>} : memref<4x256xf32, #tpu.memory_space<vmem>>, vector<4x256xf32>,
    %c0_11 = arith.constant 0 : index
    %c0_12 = arith.constant 0 : index
    %21 = vector.load %arg6[%c0_11, %c0_12] : memref<4x256xf32, #tpu.memory_space<vmem>>, vector<4x256xf32>
    %22 = arith.mulf %16, %16 : vector<4x256xf32>
    %23 = arith.mulf %6, %6 : vector<4x256xf32>
    %24 = arith.addf %22, %23 : vector<4x256xf32>
    %25 = arith.addf %21, %24 : vector<4x256xf32>
    %c0_13 = arith.constant 0 : index
    %c0_14 = arith.constant 0 : index
    %26 = vector.load %arg6[%c0_13, %c0_14] : memref<4x256xf32, #tpu.memory_space<vmem>>, vector<4x256xf32>
    tpu.vector_store %arg6[%c0_13, %c0_14], %25 {strides = array<i32>} : memref<4x256xf32, #tpu.memory_space<vmem>>, vector<4x256xf32>,
    %c0_i32_15 = arith.constant 0 : i32
    %27 = arith.cmpi eq, %arg1, %c0_i32_15 : i32
    %28 = arith.extui %27 : i1 to i32
    %c0_i32_16 = arith.constant 0 : i32
    %29 = arith.cmpi ne, %28, %c0_i32_16 : i32
    scf.if %29 {
      %c0_17 = arith.constant 0 : index
      %c0_18 = arith.constant 0 : index
      %30 = vector.load %arg5[%c0_17, %c0_18] : memref<4x256xf32, #tpu.memory_space<vmem>>, vector<4x256xf32>
      %cst_19 = arith.constant dense<0.000000e+00> : vector<4xf32>
      %31 = vector.multi_reduction <add>, %30, %cst_19 [1] : vector<4x256xf32> to vector<4xf32>
      %32 = vector.shape_cast %31 : vector<4xf32> to vector<4x1xf32>
      %c0_20 = arith.constant 0 : index
      %c0_21 = arith.constant 0 : index
      %33 = vector.load %arg6[%c0_20, %c0_21] : memref<4x256xf32, #tpu.memory_space<vmem>>, vector<4x256xf32>
      %cst_22 = arith.constant dense<0.000000e+00> : vector<4xf32>
      %34 = vector.multi_reduction <add>, %33, %cst_22 [1] : vector<4x256xf32> to vector<4xf32>
      %35 = vector.shape_cast %34 : vector<4xf32> to vector<4x1xf32>
      %36 = tpu.concatenate %32, %35 in 1 : vector<4x1xf32>, vector<4x1xf32> -> vector<4x2xf32>
      %c0_23 = arith.constant 0 : index
      %c0_24 = arith.constant 0 : index
      %c0_25 = arith.constant 0 : index
      %37 = vector.load %arg4[%c0_23, %c0_24, %c0_25] : memref<1x4x2xf32, #tpu.memory_space<vmem>>, vector<1x4x2xf32>
      %38 = vector.shape_cast %37 : vector<1x4x2xf32> to vector<4x2xf32>
      %39 = vector.shape_cast %36 : vector<4x2xf32> to vector<1x4x2xf32>
      tpu.vector_store %arg4[%c0_23, %c0_24, %c0_25], %39 {strides = array<i32>} : memref<1x4x2xf32, #tpu.memory_space<vmem>>, vector<1x4x2xf32>,
    } else {
    }
    return
  }
  func.func @transform_0(%arg0: i32, %arg1: i32) -> (i32, i32, i32) {
    %c0_i32 = arith.constant 0 : i32
    %c0_i32_0 = arith.constant 0 : i32
    return %arg0, %c0_i32, %arg1 : i32, i32, i32
  }
  func.func @transform_1(%arg0: i32, %arg1: i32) -> (i32, i32, i32) {
    %c0_i32 = arith.constant 0 : i32
    %c0_i32_0 = arith.constant 0 : i32
    return %arg0, %c0_i32, %arg1 : i32, i32, i32
  }
  func.func @transform_2(%arg0: i32, %arg1: i32) -> (i32, i32, i32) {
    %c0_i32 = arith.constant 0 : i32
    %c0_i32_0 = arith.constant 0 : i32
    %c0_i32_1 = arith.constant 0 : i32
    return %arg0, %c0_i32, %c0_i32_0 : i32, i32, i32
  }
}

</mosaic_0001>

<bundles_post_ra>
// kernel: tpu_custom_call.1
= control target key start
LH: loop header
LB: loop body
LE: loop exit
PB: predicated region body
PF: predicated region fallthrough
CT: control target
= control target key end

     0   :  { %7 = vsyncpa [#allocation5], 0  ;;  %s755_s0 = inlined_call_operand.hbm [shape: f32[2,4,256], index: 0, kind: input, shape index: {}]   ;;  %s756_s1 = inlined_call_operand.hbm [shape: f32[2,4,256], index: 1, kind: input, shape index: {}]   ;;  %s757_s2 = inlined_call_operand.vmem [shape: f32[2,4,2], index: 2, kind: output, shape index: {}]  }
   0x1   :  { %9 = vsyncpa [#allocation5 + $0x1], 0 }
   0x2   :  { %10 = vsyncpa [#allocation7], 0 }
   0x3   :  { %12 = vsyncpa [#allocation7 + $0x1], 0  ;;  %s647_s9 = smov 0   ;;  %s649_s10 = smov 0  }
   0x4   :  { %s651_s11 = smov 0   ;;  %s653_s12 = smov 0  }
   0x5   :  { %s655_s13 = smov 0   ;;  %s657_s14 = smov 0  }
   0x6 LB: > { %s432_s15 = sadd.s32 4294967295, %s630_s14   ;;  %s30_s16 = sadd.s32 1, %s626_s13  ;;  %s630_s14 = sphi %s657_s14, %s18_s14   ;;  %s626_s13 = sphi %s655_s13, %s764_s13   ;;  %s622_s12 = sphi %s653_s12, %s763_s12   ;;  %s618_s11 = sphi %s651_s11, %s762_s11   ;;  %s614_s10 = sphi %s649_s10, %s761_s10   ;;  %s610_s9 = sphi %s647_s9, %s760_s9  }
   0x7   : > { %p32_p0 = scmp.ge.s32.totalorder %s30_s16, 2  ;;  %s39_s17 = sadd.s32 1, %s618_s11 }
   0x8   : > { %p46_p1 = scmp.ne.s32.totalorder %s618_s11, %s614_s10  ;;  %p47_p2 = scmp.eq.s32.totalorder %s630_s14, 0 }
   0x9   : > { %s766_s16 = smov (%p32_p0, %s30_s16), 0  ;;  %p52_p4 = scmp.ne.s32.totalorder %s614_s10, %s610_s9 }
   0xa   : > { %p683_p3 = por %p47_p2, %p46_p1  ;;  %s34_s19 = ssub.s32 %s626_s13, %s766_s16 }
   0xb   : > { %p53_p5 = scmp.eq.s32.totalorder %s432_s15, 0  ;;  %p37_p6 = scmp.eq.s32.totalorder %s34_s19, 0 }
   0xc   : > { %p461_p8 = scmp.lt.s32.totalorder %s630_s14, 2  ;;  %s130_s22 = sand.u32 1, %s618_s11  }
   0xd   : > { %p690_p7 = por %p53_p5, %p52_p4  ;;  %s448_s23 = sshll.u32 %s626_s13, 3 }
   0xe   : > { %s696_s21 = scalar_select %p37_p6, %s618_s11, %s39_s17  }
   0xf   : > { %s436_s24 = sshll.u32 %s130_s22, 3  ;;  %s141_s27 = scalar_lea.hbm %s755_s0, %s448_s23 }
  0x10   : > { %s143_s28 = sshll.u32 %s141_s27, 4  ;;  %s134_s29 = scalar_lea.vmem [#allocation4], %s436_s24  ;;  %s144_s28 = int_to_ptr.hbm [resolvable:$true] %s143_s28 }
  0x11   : > { %s145_s30 = sshll.u32 %s134_s29, 4  ;;  %p455_p9 = pnand %p461_p8, %p683_p3  ;;  %s146_s30 = int_to_ptr.vmem [resolvable:$true] %s145_s30 }
  0x12   : > { %p442_p10 = scmp.ge.s32.totalorder %s630_s14, 1  ;;  %p172_p11 = scmp.lt.s32.totalorder %s630_s14, 3 }
  0x13   : > { %s131_s3 = scalar_lea.sflag [#allocation5], %s130_s22  ;;  %s163_s6 = scalar_lea.hbm %s756_s1, %s448_s23 }
  0x14   : > { %457 = dma.hbm_to_vmem [thread:$0]  (!%p455_p9), %s144_s28, 128, %s146_s30, %s131_s3  }
  0x15   : > { %p173_p12 = pnand %p442_p10, %p172_p11  ;;  %s165_s7 = sshll.u32 %s163_s6, 4  ;;  %s166_s7 = int_to_ptr.hbm [resolvable:$true] %s165_s7 }
  0x16   : > { %s156_s8 = scalar_lea.vmem [#allocation6], %s436_s24  ;;  %s153_s15 = scalar_lea.sflag [#allocation7], %s130_s22 }
  0x17   : > { %s167_s9 = sshll.u32 %s156_s8, 4  ;;  %176 = sbr.rel (%p173_p12) target bundleno = 240 (0xf0), region = 28  ;;  %s168_s9 = int_to_ptr.vmem [resolvable:$true] %s167_s9 }
  0x18   : > { %460 = dma.hbm_to_vmem [thread:$0]  (!%p455_p9), %s166_s7, 128, %s168_s9, %s153_s15  }
  0x19   : > { %s178_s17 = sand.u32 (!%p173_p12), 1, %s614_s10  }
  0x1a   : > { %s443_s18 = sshll.u32 (!%p173_p12), %s178_s17, 3  ;;  %s179_s19 = scalar_lea.sflag (!%p173_p12), [#allocation5], %s178_s17 }
  0x1b   : > { %s182_s25 = scalar_lea.vmem (!%p173_p12), [#allocation4], %s443_s18 }
  0x1c   : > { %601 = dma.done.wait (%p690_p7), %s179_s19, 128  }
  0x1d   : > { %603 = vsyncadd (%p690_p7), %s179_s19, 4294967168  ;;  %s189_s23 = scalar_lea.sflag [#allocation7], %s178_s17  ;;  %s715_s24 = scalar_lea.vmem [#allocation6], %s443_s18 }
  0x1e   : > { %605 = dma.done.wait (%p690_p7), %s189_s23, 128  }
  0x1f   : > { %607 = vsyncadd (%p690_p7), %s189_s23, 4294967168  ;;  %v230_v0 = vld [vmem:[%s182_s25] sm:$0xff]  ;;  %vm238_vm0 = vcmask 1043456   ;;  %v231_v41 = vld [vmem:[%s715_s24] sm:$0xff]  ;;  %p220_p13 = scmp.lt.s32.totalorder %s622_s12, 1  ;;  %vm326_vm1 = vcmask 7168  }
  0x20   : > { %233 = vst [vmem:[#allocation1] ss:$2 sm:$0xff] %v230_v0  ;;  %v295_v46 = vmul.f32 %v231_v41, %v231_v41  ;;  %vm328_vm2 = vcmask 11264  }
  0x21   : > { %s768_s12 = smov (!%p220_p13, %s622_s12), 1 }
  0x22   : > { %s445_s20 = sshll.u32 %s768_s12, 2 }
  0x23   : > { %s223_s27 = scalar_lea.vmem %s757_s2, %s445_s20 }
  0x27   : > { %v234_v1 = vld.sshfl [vmem:[#allocation1] sm:$0xff pattern:$0x75316420]  ;;  %v235_v2 = vld.sshfl [vmem:[#allocation1 + $0x8] sm:$0xff pattern:$0x75316420] }
  0x28   : > { %v239_v3 = vsel %vm238_vm0, %v234_v1, -inf  ;;  %v246_v4 = vsel %vm238_vm0, %v235_v2, -inf }
  0x29   : > { %v240_v5 = vrot.slane %v239_v3, 4  ;;  %v247_v6 = vrot.slane %v246_v4, 4 }
  0x2b   : > { %v241_v7 = vmax.f32 %v239_v3, %v240_v5  ;;  %v248_v8 = vmax.f32 %v246_v4, %v247_v6 }
  0x2d   : > { %v242_v9 = vrot.slane %v241_v7, 2  ;;  %v249_v10 = vrot.slane %v248_v8, 2 }
  0x2f   : > { %v243_v11 = vmax.f32 %v241_v7, %v242_v9  ;;  %v250_v12 = vmax.f32 %v248_v8, %v249_v10 }
  0x31   : > { %v244_v13 = vrot.slane %v243_v11, 1  ;;  %v251_v14 = vrot.slane %v250_v12, 1 }
  0x33   : > { %v245_v15 = vmax.f32 %v243_v11, %v244_v13  ;;  %v252_v16 = vmax.f32 %v250_v12, %v251_v14 }
  0x35   : > { %v255_v17 = vrot.slane %v252_v16, 4 }
  0x37   : > { %v256_v18 = vsel %vm238_vm0, %v245_v15, %v255_v17 }
  0x38   : > { %v258_v19 = vsub.f32 %v230_v0, %v256_v18 }
  0x3a   : > { %v259_v20 = vmul.f32 1.442695, %v258_v19 }
  0x3c   : > { %510 = vpow2.f32 %v259_v20 }
  0x42   : > { %v511_v21 = vpop.eup %510 }
  0x43   : > { %262 = vst [vmem:[#allocation1] ss:$2 sm:$0xff] %v511_v21 }
  0x4a   : > { %v263_v22 = vld.sshfl [vmem:[#allocation1] sm:$0xff pattern:$0x75316420]  ;;  %v264_v23 = vld.sshfl [vmem:[#allocation1 + $0x8] sm:$0xff pattern:$0x75316420] }
  0x4b   : > { %v267_v24 = vsel %vm238_vm0, %v263_v22, 0.0  ;;  %v274_v25 = vsel %vm238_vm0, %v264_v23, 0.0 }
  0x4c   : > { %v268_v26 = vrot.slane %v267_v24, 4  ;;  %v275_v27 = vrot.slane %v274_v25, 4 }
  0x4e   : > { %v269_v28 = vadd.f32 %v268_v26, %v267_v24  ;;  %v276_v29 = vadd.f32 %v275_v27, %v274_v25 }
  0x50   : > { %v270_v30 = vrot.slane %v269_v28, 2  ;;  %v277_v31 = vrot.slane %v276_v29, 2 }
  0x52   : > { %v271_v32 = vadd.f32 %v270_v30, %v269_v28  ;;  %v278_v33 = vadd.f32 %v277_v31, %v276_v29 }
  0x54   : > { %v272_v34 = vrot.slane %v271_v32, 1  ;;  %v279_v35 = vrot.slane %v278_v33, 1 }
  0x56   : > { %v273_v36 = vadd.f32 %v272_v34, %v271_v32  ;;  %v280_v37 = vadd.f32 %v279_v35, %v278_v33 }
  0x58   : > { %512 = vrcp.f32 %v273_v36 }
  0x59   : > { %514 = vrcp.f32 %v280_v37 }
  0x5e   : > { %v513_v38 = vpop.eup %512 }
  0x5f   : > { %v515_v39 = vpop.eup %514 }
  0x60   : > { %v285_v40 = vrot.slane %v515_v39, 4 }
  0x62   : > { %v286_v42 = vsel %vm238_vm0, %v513_v38, %v285_v40 }
  0x63   : > { %v288_v43 = vmul.f32 %v511_v21, %v286_v42 }
  0x65   : > { %v290_v44 = vmul.f32 %v288_v43, %v231_v41  ;;  %v294_v45 = vmul.f32 %v288_v43, %v288_v43 }
  0x67   : > { %304 = vst [vmem:[#allocation1] ss:$2 sm:$0xff] %v290_v44  ;;  %v296_v47 = vadd.f32 %v295_v46, %v294_v45 }
  0x6e   : > { %v305_v48 = vld.sshfl [vmem:[#allocation1] sm:$0xff pattern:$0x75316420]  ;;  %v306_v49 = vld.sshfl [vmem:[#allocation1 + $0x8] sm:$0xff pattern:$0x75316420] }
  0x6f   : > { %v309_v50 = vsel %vm238_vm0, %v305_v48, 0.0  ;;  %v310_v51 = vsel %vm238_vm0, %v306_v49, 0.0  ;;  %316 = vst [vmem:[#allocation1] ss:$2 sm:$0xff] %v296_v47 }
  0x70   : > { %v311_v52 = vadd.f32 %v310_v51, %v309_v50 }
  0x72   : > { %312 = vadd.xlane.f32.xlu0 %v311_v52 }
  0x76   : > { %v317_v53 = vld.sshfl [vmem:[#allocation1] sm:$0xff pattern:$0x75316420]  ;;  %v318_v54 = vld.sshfl [vmem:[#allocation1 + $0x8] sm:$0xff pattern:$0x75316420] }
  0x77   : > { %v321_v55 = vsel %vm238_vm0, %v317_v53, 0.0  ;;  %v322_v56 = vsel %vm238_vm0, %v318_v54, 0.0 }
  0x78   : > { %v323_v57 = vadd.f32 %v322_v56, %v321_v55 }
  0x7a   : > { %324 = vadd.xlane.f32.xlu0 %v323_v57 }
  0xe5   : > { %v313_v58 = vpop.xlane.xlu0 %312 }
  0xed   : > { %v325_v59 = vpop.xlane.xlu0 %324 }
  0xee   : > { %v327_v60 = vsel %vm326_vm1, %v313_v58, %v325_v59 }
  0xef   : > { %329 = vst.msk [vmem:[%s223_s27] sm:$0xf] %vm328_vm2, %v327_v60 }
  0xf0 PF: > { %s18_s14 = sadd.s32 1, %s630_s14   ;;  %s760_s9 = smov %s614_s10 }
  0xf1   : > { %p15_p0 = scmp.ge.s32.totalorder %s18_s14, 4   ;;  %s761_s10 = smov %s618_s11 }
  0xf2   : > { %s762_s11 = smov %s696_s21  ;;  %s763_s12 = smov %s626_s13 }
  0xf3   : > { %s764_s13 = smov %s766_s16  ;;  %17 = sbr.rel (!%p15_p0) target bundleno = 6 (0x6), region = 89 }
  0xf8   :  { %349 = vsyncpa [#allocation5], 1 }
  0xf9   :  { %351 = vsyncpa [#allocation5 + $0x1], 1 }
  0xfa   :  { %352 = vsyncpa [#allocation7], 1 }
  0xfb   :  { %354 = vsyncpa [#allocation7 + $0x1], 1 }

</bundles_post_ra>
